<compile_context>
chip_gen: v7x
topology: tpu7x:2x2x1
jax: 0.10.0
libtpu: 0.0.40
codegen_flags: <defaults>
</compile_context>

<pallas_src>
import jax
import jax.numpy as jnp
from jax.experimental import pallas as pl
from jax.experimental.pallas import tpu as pltpu


def _linear_bias_kernel(x_ref, w_ref, b_ref, out_ref):
    """x_ref: (tile_n, D); w_ref: (D, L); b_ref: (1, L); out_ref: (tile_n, L)."""
    out_ref[...] = (
        jnp.dot(x_ref[...], w_ref[...], preferred_element_type=jnp.float32)
        + b_ref[...].astype(jnp.float32)
    ).astype(out_ref.dtype)


def _round_up(x, m):
    return ((x + m - 1) // m) * m


def _choose_tile_rows(rows, requested):
    """Pick the row-tile: as large as possible (<= requested, multiple of 8) while
    keeping >=2 grid steps whenever there is more than one sublane-group of rows
    (so v7x's two TensorCores both get work and the pipeline can overlap)."""
    requested = max(8, (requested // 8) * 8)
    if rows <= 8:
        return rows                       # single block with exact (full-dim) shape
    steps = max(2, pl.cdiv(rows, requested))
    return min(_round_up(pl.cdiv(rows, steps), 8), requested)


def _linear_pallas(x2, w_t, b2, tile_n):
    """x2: (rows, D); w_t: (D, L); b2: (1, L) f32.  Returns (rows, L) f32."""
    rows, D = x2.shape
    L = w_t.shape[1]
    tile = _choose_tile_rows(rows, tile_n)
    grid = pl.cdiv(rows, tile)            # ragged last block handled by Pallas masking

    cost = pl.CostEstimate(
        flops=2 * rows * D * L,
        transcendentals=0,
        bytes_accessed=int(
            x2.size * x2.dtype.itemsize
            + w_t.size * w_t.dtype.itemsize
            + b2.size * 4
            + rows * L * 4
        ),
    )

    return pl.pallas_call(
        _linear_bias_kernel,
        out_shape=jax.ShapeDtypeStruct((rows, L), jnp.float32),
        grid_spec=pltpu.PrefetchScalarGridSpec(
            num_scalar_prefetch=0,
            grid=(grid,),
            in_specs=[
                pl.BlockSpec((tile, D), lambda i: (i, 0)),
                pl.BlockSpec((D, L), lambda i: (0, 0)),   # resident weight
                pl.BlockSpec((1, L), lambda i: (0, 0)),   # resident bias
            ],
            out_specs=pl.BlockSpec((tile, L), lambda i: (i, 0)),
        ),
        compiler_params=pltpu.CompilerParams(
            dimension_semantics=("parallel",),
            vmem_limit_bytes=32 * 1024 * 1024,
        ),
        cost_estimate=cost,
    )(x2, w_t, b2)


def intent_classifier_forward(x, weight, bias, *, tile_n=4096, cast_inputs_to_bf16=False):
    """IntentClassifier forward: dropout (identity in eval) + nn.Linear.

    x:      (..., D) float32 (any number of leading batch dims)
    weight: (L, D)  -- PyTorch nn.Linear layout
    bias:   (L,)
    returns (..., L) float32
    """
    # TODO(synk): training-mode dropout would need pltpu.prng_seed / prng_random_bits.
    orig_shape = x.shape
    D = orig_shape[-1]
    L = weight.shape[0]

    x2 = x.reshape(-1, D)                       # free contiguous view over batch dims
    N = x2.shape[0]

    w_t = weight.T.astype(jnp.float32)          # (D, L): kernel computes x @ W.T as x @ w_t
    b2 = bias.reshape(1, L).astype(jnp.float32)

    # Lane-packing for small D: fold `pack` logical rows into one 128-lane row
    # (free contiguous reshapes); weight becomes block-diagonal, bias is tiled.
    pack = (128 // D) if (D < 128 and 128 % D == 0) else 1
    if pack > 1 and N > 0 and N % pack == 0:
        xp = x2.reshape(N // pack, pack * D)                        # (N/pack, 128)
        w_p = jnp.kron(jnp.eye(pack, dtype=jnp.float32), w_t)       # (pack*D, pack*L)
        b_p = jnp.tile(b2, (1, pack))                                # (1, pack*L)
        if cast_inputs_to_bf16:
            xp = xp.astype(jnp.bfloat16)
            w_p = w_p.astype(jnp.bfloat16)
        out = _linear_pallas(xp, w_p, b_p, tile_n).reshape(N, L)
    else:
        if cast_inputs_to_bf16:
            x2 = x2.astype(jnp.bfloat16)
            w_t = w_t.astype(jnp.bfloat16)
        out = _linear_pallas(x2, w_t, b2, tile_n)                    # (N, L)

    return out.reshape(*orig_shape[:-1], L)


def intent_classifier_ref(x, weight, bias):
    """Pure-JAX reference following PyTorch nn.Linear exactly (dropout = identity)."""
    return x @ weight.T + bias


if __name__ == "__main__":
    input_dim = 32          # hidden size of the encoder output
    num_intent_labels = 8
    k = 1.0 / (input_dim ** 0.5)   # PyTorch nn.Linear default init scale

    key = jax.random.PRNGKey(0)
    kx1, kx2, kx3, kw, kb = jax.random.split(key, 5)

    weight = jax.random.uniform(kw, (num_intent_labels, input_dim),
                                minval=-k, maxval=k, dtype=jnp.float32)
    bias = jax.random.uniform(kb, (num_intent_labels,),
                              minval=-k, maxval=k, dtype=jnp.float32)

    # Case 1: pooled-output style (B, D) with B divisible by the lane-pack factor
    # -> exercises the packed (block-diagonal weight) path.
    x1 = jax.random.normal(kx1, (8, input_dim), dtype=jnp.float32)
    out1 = jax.block_until_ready(intent_classifier_forward(x1, weight, bias))
    ref1 = intent_classifier_ref(x1, weight, bias)
    assert out1.shape == (8, num_intent_labels)
    assert jnp.allclose(out1, ref1, atol=1e-5, rtol=1e-5), "mismatch (packed 2D input)"

    # Case 2: (B, S, D) with N=14 -> exercises flatten + unpacked path with a
    # ragged last grid block (no wrapper-side jnp.pad).
    x2 = jax.random.normal(kx2, (2, 7, input_dim), dtype=jnp.float32)
    out2 = jax.block_until_ready(intent_classifier_forward(x2, weight, bias))
    ref2 = intent_classifier_ref(x2, weight, bias)
    assert out2.shape == (2, 7, num_intent_labels)
    assert jnp.allclose(out2, ref2, atol=1e-5, rtol=1e-5), "mismatch (ragged 3D input)"

    # Case 3: (B, S, D) with N=128 -> packed path with a multi-step grid.
    x3 = jax.random.normal(kx3, (16, 8, input_dim), dtype=jnp.float32)
    out3 = jax.block_until_ready(intent_classifier_forward(x3, weight, bias))
    ref3 = intent_classifier_ref(x3, weight, bias)
    assert out3.shape == (16, 8, num_intent_labels)
    assert jnp.allclose(out3, ref3, atol=1e-5, rtol=1e-5), "mismatch (packed multi-step)"

    print("KERNEL_OK")
</pallas_src>

<mosaic_0001>
module attributes {stable_mosaic.version = 11 : i64} {
  func.func @_linear_bias_kernel(%arg0: i32, %arg1: memref<2x128xf32, #tpu.memory_space<vmem>>, %arg2: memref<128x32xf32, #tpu.memory_space<vmem>>, %arg3: memref<1x32xf32, #tpu.memory_space<vmem>>, %arg4: memref<2x32xf32, #tpu.memory_space<vmem>>) attributes {dimension_semantics = [#tpu.dimension_semantics<parallel>], iteration_bounds = array<i64: 1>, scalar_prefetch = 0 : i64, scratch_operands = 0 : i64, tpu.core_type = #tpu.core_type<tc>, window_params = [{transform_indices = @transform_0, window_bounds = array<i64: 2, 128>}, {pipeline_mode = #tpu.pipeline_mode<synchronous>, transform_indices = @transform_1, window_bounds = array<i64: 128, 32>}, {pipeline_mode = #tpu.pipeline_mode<synchronous>, transform_indices = @transform_2, window_bounds = array<i64: 1, 32>}, {transform_indices = @transform_3, window_bounds = array<i64: 2, 32>}]} {
    %c0 = arith.constant 0 : index
    %c0_0 = arith.constant 0 : index
    %0 = vector.load %arg1[%c0, %c0_0] : memref<2x128xf32, #tpu.memory_space<vmem>>, vector<2x128xf32>
    %c0_1 = arith.constant 0 : index
    %c0_2 = arith.constant 0 : index
    %1 = vector.load %arg2[%c0_1, %c0_2] : memref<128x32xf32, #tpu.memory_space<vmem>>, vector<128x32xf32>
    %cst = arith.constant dense<0.000000e+00> : vector<2x32xf32>
    %2 = tpu.matmul %0, %1, %cst {dimension_numbers = #tpu.dot_dimension_numbers<[1], [0], [0], [1], [0, 0, 1, 1], [], []>} : vector<2x128xf32>, vector<128x32xf32>, vector<2x32xf32> -> vector<2x32xf32>
    %c0_3 = arith.constant 0 : index
    %c0_4 = arith.constant 0 : index
    %3 = vector.load %arg3[%c0_3, %c0_4] : memref<1x32xf32, #tpu.memory_space<vmem>>, vector<1x32xf32>
    %4 = vector.broadcast %3 : vector<1x32xf32> to vector<2x32xf32>
    %5 = arith.addf %2, %4 : vector<2x32xf32>
    %c0_5 = arith.constant 0 : index
    %c0_6 = arith.constant 0 : index
    %6 = vector.load %arg4[%c0_5, %c0_6] : memref<2x32xf32, #tpu.memory_space<vmem>>, vector<2x32xf32>
    tpu.vector_store %arg4[%c0_5, %c0_6], %5 {strides = array<i32>} : memref<2x32xf32, #tpu.memory_space<vmem>>, vector<2x32xf32>,
    return
  }
  func.func @transform_0(%arg0: i32) -> (i32, i32) {
    %c0_i32 = arith.constant 0 : i32
    %c0_i32_0 = arith.constant 0 : i32
    return %arg0, %c0_i32 : i32, i32
  }
  func.func @transform_1(%arg0: i32) -> (i32, i32) {
    %c0_i32 = arith.constant 0 : i32
    %c0_i32_0 = arith.constant 0 : i32
    %c0_i32_1 = arith.constant 0 : i32
    return %c0_i32, %c0_i32_0 : i32, i32
  }
  func.func @transform_2(%arg0: i32) -> (i32, i32) {
    %c0_i32 = arith.constant 0 : i32
    %c0_i32_0 = arith.constant 0 : i32
    %c0_i32_1 = arith.constant 0 : i32
    return %c0_i32, %c0_i32_0 : i32, i32
  }
  func.func @transform_3(%arg0: i32) -> (i32, i32) {
    %c0_i32 = arith.constant 0 : i32
    %c0_i32_0 = arith.constant 0 : i32
    return %arg0, %c0_i32 : i32, i32
  }
}

</mosaic_0001>

<bundles_post_ra>
// kernel: tpu_custom_call.1
= control target key start
LH: loop header
LB: loop body
LE: loop exit
PB: predicated region body
PF: predicated region fallthrough
CT: control target
= control target key end

     0   :  { %v230_v3 = vmov 0.0|0.0   ;;  %vm231_vm0 = vmmov 0   ;;  %v232_v6 = vmov 0.0   ;;  %s320_s0 = inlined_call_operand.vmem [shape: f32[2,128], index: 0, kind: input, shape index: {}]   ;;  %s321_s1 = inlined_call_operand.vmem [shape: f32[128,32], index: 1, kind: input, shape index: {}]   ;;  %s322_s2 = inlined_call_operand.vmem [shape: f32[1,32], index: 2, kind: input, shape index: {}]   ;;  %s323_s3 = inlined_call_operand.hbm [shape: f32[2,32], index: 3, kind: output, shape index: {}]  }
   0x1   :  { %v16_v0 = vld [vmem:[%s321_s1] sm:$0xff]  ;;  %v17_v1 = vld [vmem:[%s321_s1 + $0x8] sm:$0xff]  ;;  %v18_v2 = vld [vmem:[%s321_s1 + $0x10] sm:$0xff]  ;;  %178 = vmatprep.subr.bf16.mxu0 %v230_v3  ;;  %175 = vmatprep.mubr.msk.f32.mxu0 %vm231_vm0, %v232_v6 }
   0x2   :  { %v179_v4 = vpack.c.bf16 %v17_v1, %v16_v0  ;;  %v19_v5 = vld [vmem:[%s321_s1 + $0x18] sm:$0xff]  ;;  %v20_v8 = vld [vmem:[%s321_s1 + $0x20] sm:$0xff]  ;;  %v21_v9 = vld [vmem:[%s321_s1 + $0x28] sm:$0xff] }
   0x3   :  { %v182_v7 = vpack.c.bf16 %v19_v5, %v18_v2 }
   0x4   :  { %180 = vmatpush3.bf16.msra.mxu0 %v179_v4 }
   0x5   :  { %181 = vmatprep.subr.bf16.mxu0 %v230_v3 }
   0x6   :  { %8 = vsyncpa [#allocation3], 0  ;;  %v185_v10 = vpack.c.bf16 %v21_v9, %v20_v8  ;;  %v22_v11 = vld [vmem:[%s321_s1 + $0x30] sm:$0xff]  ;;  %v23_v12 = vld [vmem:[%s321_s1 + $0x38] sm:$0xff]  ;;  %s233_s21 = smov [#allocation2]   ;;  %vm109_vm1 = vcmask 254976  }
   0x7   :  { %v188_v13 = vpack.c.bf16 %v23_v12, %v22_v11  ;;  %v24_v14 = vld [vmem:[%s321_s1 + $0x40] sm:$0xff]  ;;  %v25_v15 = vld [vmem:[%s321_s1 + $0x48] sm:$0xff]  ;;  %v26_v17 = vld [vmem:[%s321_s1 + $0x50] sm:$0xff]  ;;  %s117_s22 = sshll.u32 %s233_s21, 4  ;;  %s118_s22 = int_to_ptr.vmem [resolvable:$true] %s117_s22 }
   0x8   :  { %183 = vmatpush3.bf16.msra.mxu0 %v182_v7  ;;  %v191_v16 = vpack.c.bf16 %v25_v15, %v24_v14  ;;  %v27_v18 = vld [vmem:[%s321_s1 + $0x58] sm:$0xff]  ;;  %v28_v20 = vld [vmem:[%s321_s1 + $0x60] sm:$0xff]  ;;  %v29_v21 = vld [vmem:[%s321_s1 + $0x68] sm:$0xff]  ;;  %p211_p1 = scmp.lt.s32.totalorder %s118_s22, %s118_s22 }
   0x9   :  { %184 = vmatprep.subr.bf16.mxu0 %v230_v3  ;;  %v194_v19 = vpack.c.bf16 %v27_v18, %v26_v17  ;;  %v197_v22 = vpack.c.bf16 %v29_v21, %v28_v20  ;;  %v30_v23 = vld [vmem:[%s321_s1 + $0x70] sm:$0xff]  ;;  %v31_v24 = vld [vmem:[%s321_s1 + $0x78] sm:$0xff]  ;;  %v15_v26 = vld [vmem:[%s320_s0] sm:$0x3]  ;;  %s206_s1 = scalar_lea.vmem %s118_s22, 32 }
   0xa   :  { %v200_v25 = vpack.c.bf16 %v31_v24, %v30_v23  ;;  %v125_v27 = vld [vmem:[%s322_s2] ss:$0 sm:$0xff]  ;;  %p207_p0 = scmp.ne.s32.totalorder %s118_s22, %s206_s1  ;;  %p212_p2 = scmp.lt.s32.totalorder %s206_s1, %s206_s1 }
   0xc   :  { %186 = vmatpush3.bf16.msra.mxu0 %v185_v10  ;;  %p213_p3 = por %p212_p2, %p211_p1 }
   0xd   :  { %187 = vmatprep.subr.bf16.mxu0 %v230_v3 }
   0xe   :  { %p214_p4 = pnand %p213_p3, %p207_p0 }
  0x10   :  { %189 = vmatpush3.bf16.msra.mxu0 %v188_v13 }
  0x11   :  { %190 = vmatprep.subr.bf16.mxu0 %v230_v3 }
  0x14   :  { %192 = vmatpush3.bf16.msra.mxu0 %v191_v16 }
  0x15   :  { %193 = vmatprep.subr.bf16.mxu0 %v230_v3 }
  0x18   :  { %195 = vmatpush3.bf16.msra.mxu0 %v194_v19 }
  0x19   :  { %196 = vmatprep.subr.bf16.mxu0 %v230_v3 }
  0x1c   :  { %198 = vmatpush3.bf16.msra.mxu0 %v197_v22 }
  0x1d   :  { %199 = vmatprep.subr.bf16.mxu0 %v230_v3 }
  0x20   :  { %201 = vmatpush3.bf16.msra.mxu0 %v200_v25 }
  0x23   :  { %176 = vmatmul.mubr.f32.vlgmr.msra.gmra.mrb[0].mxu0 %v15_v26 }
  0xf6   :  { %v105_v28 = vpop.f32.mrb[0].mxu0 }
  0xf7   :  { %v106_v29 = vadd.f32 %v125_v27, %v105_v28  ;;  %v177_v30 = vpop.f32.mrb[1].mxu0 }
  0xf9   :  { %110 = vst.msk [vmem:[#allocation2] sm:$0x3] %vm109_vm1, %v106_v29 }
  0xfa   :  { %217 = shalt.err (!%p214_p4)
}
  0xfb   :  { %s218_s24 = scalar_lea.hbm %s323_s3, 32 }
  0xfc   :  { %p219_p5 = scmp.ne.s32.totalorder %s323_s3, %s218_s24  ;;  %p222_p6 = scmp.lt.u32.totalorder %s218_s24, %s323_s3 }
  0xfe   :  { %p224_p7 = pnand %p222_p6, %p219_p5 }
 0x100   :  { %227 = shalt.err (!%p224_p7)
}
 0x101   :  { %120 = dma.vmem_to_hbm [thread:$0]  %s118_s22, 32, %s323_s3, [#allocation3]  }
 0x102   :  { %228 = dma.done.wait [#allocation3], 32  }
 0x103   :  { %229 = vsyncadd [#allocation3], 4294967264 }
 0x104   :  { %124 = vsyncpa [#allocation3], 1 }

</bundles_post_ra>
